<compile_context>
chip_gen: v6e
topology: v6e:2x2x1
jax: 0.10.0
libtpu: 0.0.40
codegen_flags: <defaults>
</compile_context>

<pallas_src>
import functools

import jax
import jax.numpy as jnp
from jax.experimental import pallas as pl
from jax.experimental.pallas import tpu as pltpu

LANES = 128
MAX_TILE_ROWS = 2048   # 1 MiB per f32 input tile; 2 in x 2 buf ~ 4 MiB VMEM
NUM_SPLITS = 2         # leading "parallel" grid axis (v7x dual TensorCore)


def _silog_partial_kernel(pred_ref, target_ref, ssq_ref, ssum_ref, cnt_ref,
                          *, rows, tile_rows, steps):
    c = pl.program_id(0)   # core-split index ("parallel")
    i = pl.program_id(1)   # step within this split ("arbitrary" / reduction)

    # Zero this split's resident partial accumulators on its first step.
    @pl.when(i == 0)
    def _():
        ssq_ref[...] = jnp.zeros_like(ssq_ref)
        ssum_ref[...] = jnp.zeros_like(ssum_ref)
        cnt_ref[...] = jnp.zeros_like(cnt_ref)

    t = target_ref[...].astype(jnp.float32)
    p = pred_ref[...].astype(jnp.float32)

    # Global row index of every element in this tile.  Tiles whose block index
    # was clamped in the index_map (or the ragged tail of the last real tile)
    # get fully masked here, so no wrapper-side padding of the inputs needed.
    blk = c * steps + i
    row_ids = blk * tile_rows + jax.lax.broadcasted_iota(jnp.int32, t.shape, 0)
    mask = (t > 0.0) & (row_ids < rows)

    # One log per element (log(t/p)) instead of log(t) - log(p); guard the
    # masked-out lanes so log never sees non-positive inputs.
    safe_t = jnp.where(mask, t, 1.0)
    safe_p = jnp.where(mask, p, 1.0)
    d = jnp.where(mask, jnp.log(safe_t / safe_p), 0.0)
    valid = mask.astype(jnp.float32)

    # Fold (tile_rows, 128) -> (8, 128): layout-preserving reshape + VPU adds.
    def fold(x):
        return x.reshape(tile_rows // 8, 8, LANES).sum(axis=0)

    ssq_ref[0] += fold(d * d)
    ssum_ref[0] += fold(d)
    cnt_ref[0] += fold(valid)


def silog_loss(pred, target, lambd=0.95):
    """Pallas implementation of SiLogLoss.forward."""
    n = pred.size
    itemsize = jnp.dtype(pred.dtype).itemsize
    sublanes = {4: 8, 2: 16, 1: 32}.get(itemsize, 8)

    rows = pl.cdiv(n, LANES)
    rows = pl.cdiv(rows, sublanes) * sublanes      # keep (sublanes, 128) tileable
    padded = rows * LANES

    pred_flat = pred.reshape(-1)
    targ_flat = target.reshape(-1)
    if padded != n:
        # Rare path (element count not a multiple of sublanes*128); padded
        # target elements are 0 so they are masked out by `t > 0`.
        pred_flat = jnp.pad(pred_flat, (0, padded - n), constant_values=1)
        targ_flat = jnp.pad(targ_flat, (0, padded - n), constant_values=0)
    pred2d = pred_flat.reshape(rows, LANES)
    targ2d = targ_flat.reshape(rows, LANES)

    tile_rows = min(MAX_TILE_ROWS, rows)
    nblocks = pl.cdiv(rows, tile_rows)
    steps = pl.cdiv(nblocks, NUM_SPLITS)

    def in_map(c, i):
        # Clamp so a phantom trailing tile never DMAs out of bounds; its
        # contribution is zeroed in-kernel via the row mask.
        return (jnp.minimum(c * steps + i, nblocks - 1), 0)

    def out_map(c, i):
        return (c, 0, 0)

    kernel = functools.partial(
        _silog_partial_kernel, rows=rows, tile_rows=tile_rows, steps=steps)

    part_shape = jax.ShapeDtypeStruct((NUM_SPLITS, 8, LANES), jnp.float32)
    out_spec = pl.BlockSpec((1, 8, LANES), out_map)

    ssq_p, ssum_p, cnt_p = pl.pallas_call(
        kernel,
        out_shape=(part_shape, part_shape, part_shape),
        grid_spec=pltpu.PrefetchScalarGridSpec(
            num_scalar_prefetch=0,
            grid=(NUM_SPLITS, steps),
            in_specs=[
                pl.BlockSpec((tile_rows, LANES), in_map),
                pl.BlockSpec((tile_rows, LANES), in_map),
            ],
            out_specs=(out_spec, out_spec, out_spec),
        ),
        compiler_params=pltpu.CompilerParams(
            dimension_semantics=("parallel", "arbitrary")),
    )(pred2d, targ2d)

    # Tiny final reductions + scalar combine in plain JAX.
    ssq = jnp.sum(ssq_p)
    ssum = jnp.sum(ssum_p)
    cnt = jnp.sum(cnt_p)

    mean_sq = ssq / cnt
    mean_d = ssum / cnt
    # Clamp tiny negative fp error before the sqrt (same formula as PyTorch).
    return jnp.sqrt(jnp.maximum(mean_sq - lambd * mean_d * mean_d, 0.0))


def silog_loss_ref(pred, target, lambd=0.95):
    """Pure-JAX reference mirroring the PyTorch module."""
    pred = pred.astype(jnp.float32)
    target = target.astype(jnp.float32)
    mask = target > 0.0
    d = jnp.where(
        mask,
        jnp.log(jnp.where(mask, target, 1.0)) - jnp.log(jnp.where(mask, pred, 1.0)),
        0.0,
    )
    cnt = jnp.sum(mask.astype(jnp.float32))
    mean_sq = jnp.sum(d * d) / cnt
    mean_d = jnp.sum(d) / cnt
    return jnp.sqrt(jnp.maximum(mean_sq - lambd * mean_d * mean_d, 0.0))


if __name__ == "__main__":
    key = jax.random.PRNGKey(0)
    k1, k2, k3 = jax.random.split(key, 3)

    # NCHW inputs, like a depth-prediction head: pred strictly positive,
    # target positive where valid and 0 where invalid.
    shape = (2, 4, 16, 16)
    pred = jnp.exp(jax.random.normal(k1, shape, dtype=jnp.float32) * 0.3) + 0.1
    target_vals = jnp.exp(jax.random.normal(k2, shape, dtype=jnp.float32) * 0.3) + 0.1
    valid = jax.random.uniform(k3, shape) > 0.3
    target = jnp.where(valid, target_vals, 0.0)

    loss = jax.block_until_ready(silog_loss(pred, target))
    loss_ref = jax.block_until_ready(silog_loss_ref(pred, target))

    assert jnp.isfinite(loss), "loss is not finite"
    assert jnp.allclose(loss, loss_ref, rtol=1e-5, atol=1e-6), (loss, loss_ref)
    print("KERNEL_OK")
</pallas_src>

<mosaic_0001>
module attributes {stable_mosaic.version = 11 : i64} {
  func.func @_silog_partial_kernel(%arg0: i32, %arg1: i32, %arg2: memref<16x128xf32, #tpu.memory_space<vmem>>, %arg3: memref<16x128xf32, #tpu.memory_space<vmem>>, %arg4: memref<1x8x128xf32, #tpu.memory_space<vmem>>, %arg5: memref<1x8x128xf32, #tpu.memory_space<vmem>>, %arg6: memref<1x8x128xf32, #tpu.memory_space<vmem>>) attributes {dimension_semantics = [#tpu.dimension_semantics<parallel>, #tpu.dimension_semantics<arbitrary>], iteration_bounds = array<i64: 2, 1>, scalar_prefetch = 0 : i64, scratch_operands = 0 : i64, tpu.core_type = #tpu.core_type<tc>, window_params = [{transform_indices = @transform_0, window_bounds = array<i64: 16, 128>}, {transform_indices = @transform_1, window_bounds = array<i64: 16, 128>}, {transform_indices = @transform_2, window_bounds = array<i64: 1, 8, 128>}, {transform_indices = @transform_3, window_bounds = array<i64: 1, 8, 128>}, {transform_indices = @transform_4, window_bounds = array<i64: 1, 8, 128>}]} {
    %c0_i32 = arith.constant 0 : i32
    %0 = arith.cmpi eq, %arg1, %c0_i32 : i32
    %1 = arith.extui %0 : i1 to i32
    %c0_i32_0 = arith.constant 0 : i32
    %2 = arith.cmpi ne, %1, %c0_i32_0 : i32
    scf.if %2 {
      %cst_29 = arith.constant 0.000000e+00 : f32
      %51 = vector.broadcast %cst_29 : f32 to vector<1x8x128xf32>
      %c0_30 = arith.constant 0 : index
      %c0_31 = arith.constant 0 : index
      %c0_32 = arith.constant 0 : index
      %52 = vector.load %arg4[%c0_30, %c0_31, %c0_32] : memref<1x8x128xf32, #tpu.memory_space<vmem>>, vector<1x8x128xf32>
      tpu.vector_store %arg4[%c0_30, %c0_31, %c0_32], %51 {strides = array<i32>} : memref<1x8x128xf32, #tpu.memory_space<vmem>>, vector<1x8x128xf32>,
      %cst_33 = arith.constant 0.000000e+00 : f32
      %53 = vector.broadcast %cst_33 : f32 to vector<1x8x128xf32>
      %c0_34 = arith.constant 0 : index
      %c0_35 = arith.constant 0 : index
      %c0_36 = arith.constant 0 : index
      %54 = vector.load %arg5[%c0_34, %c0_35, %c0_36] : memref<1x8x128xf32, #tpu.memory_space<vmem>>, vector<1x8x128xf32>
      tpu.vector_store %arg5[%c0_34, %c0_35, %c0_36], %53 {strides = array<i32>} : memref<1x8x128xf32, #tpu.memory_space<vmem>>, vector<1x8x128xf32>,
      %cst_37 = arith.constant 0.000000e+00 : f32
      %55 = vector.broadcast %cst_37 : f32 to vector<1x8x128xf32>
      %c0_38 = arith.constant 0 : index
      %c0_39 = arith.constant 0 : index
      %c0_40 = arith.constant 0 : index
      %56 = vector.load %arg6[%c0_38, %c0_39, %c0_40] : memref<1x8x128xf32, #tpu.memory_space<vmem>>, vector<1x8x128xf32>
      tpu.vector_store %arg6[%c0_38, %c0_39, %c0_40], %55 {strides = array<i32>} : memref<1x8x128xf32, #tpu.memory_space<vmem>>, vector<1x8x128xf32>,
    } else {
    }
    %c0 = arith.constant 0 : index
    %c0_1 = arith.constant 0 : index
    %3 = vector.load %arg3[%c0, %c0_1] : memref<16x128xf32, #tpu.memory_space<vmem>>, vector<16x128xf32>
    %c0_2 = arith.constant 0 : index
    %c0_3 = arith.constant 0 : index
    %4 = vector.load %arg2[%c0_2, %c0_3] : memref<16x128xf32, #tpu.memory_space<vmem>>, vector<16x128xf32>
    %c1_i32 = arith.constant 1 : i32
    %5 = arith.muli %arg0, %c1_i32 : i32
    %6 = arith.addi %5, %arg1 : i32
    %c16_i32 = arith.constant 16 : i32
    %7 = arith.muli %6, %c16_i32 : i32
    %8 = tpu.iota {dimensions = array<i32: 0>} : vector<16x128xi32>
    %9 = vector.broadcast %7 : i32 to vector<16x128xi32>
    %10 = arith.addi %9, %8 : vector<16x128xi32>
    %cst = arith.constant 0.000000e+00 : f32
    %11 = vector.broadcast %cst : f32 to vector<16x128xf32>
    %12 = arith.cmpf ogt, %3, %11 : vector<16x128xf32>
    %c16_i32_4 = arith.constant 16 : i32
    %13 = vector.broadcast %c16_i32_4 : i32 to vector<16x128xi32>
    %14 = arith.cmpi slt, %10, %13 : vector<16x128xi32>
    %15 = arith.andi %12, %14 : vector<16x128xi1>
    %cst_5 = arith.constant 1.000000e+00 : f32
    %16 = vector.broadcast %cst_5 : f32 to vector<16x128xf32>
    %17 = arith.select %15, %3, %16 : vector<16x128xi1>, vector<16x128xf32>
    %cst_6 = arith.constant 1.000000e+00 : f32
    %18 = vector.broadcast %cst_6 : f32 to vector<16x128xf32>
    %19 = arith.select %15, %4, %18 : vector<16x128xi1>, vector<16x128xf32>
    %20 = arith.divf %17, %19 : vector<16x128xf32>
    %21 = math.log %20 : vector<16x128xf32>
    %cst_7 = arith.constant 0.000000e+00 : f32
    %22 = vector.broadcast %cst_7 : f32 to vector<16x128xf32>
    %23 = arith.select %15, %21, %22 : vector<16x128xi1>, vector<16x128xf32>
    %24 = arith.extui %15 : vector<16x128xi1> to vector<16x128xi32>
    %25 = arith.sitofp %24 : vector<16x128xi32> to vector<16x128xf32>
    %c0_8 = arith.constant 0 : index
    %c0_9 = arith.constant 0 : index
    %c0_10 = arith.constant 0 : index
    %26 = vector.load %arg4[%c0_8, %c0_9, %c0_10] : memref<1x8x128xf32, #tpu.memory_space<vmem>>, vector<1x8x128xf32>
    %27 = vector.shape_cast %26 : vector<1x8x128xf32> to vector<8x128xf32>
    %28 = arith.mulf %23, %23 : vector<16x128xf32>
    %29 = vector.shape_cast %28 : vector<16x128xf32> to vector<2x8x128xf32>
    %cst_11 = arith.constant dense<0.000000e+00> : vector<8x128xf32>
    %30 = vector.multi_reduction <add>, %29, %cst_11 [0] : vector<2x8x128xf32> to vector<8x128xf32>
    %31 = arith.addf %27, %30 : vector<8x128xf32>
    %c0_12 = arith.constant 0 : index
    %c0_13 = arith.constant 0 : index
    %c0_14 = arith.constant 0 : index
    %32 = vector.load %arg4[%c0_12, %c0_13, %c0_14] : memref<1x8x128xf32, #tpu.memory_space<vmem>>, vector<1x8x128xf32>
    %33 = vector.shape_cast %32 : vector<1x8x128xf32> to vector<8x128xf32>
    %34 = vector.shape_cast %31 : vector<8x128xf32> to vector<1x8x128xf32>
    tpu.vector_store %arg4[%c0_12, %c0_13, %c0_14], %34 {strides = array<i32>} : memref<1x8x128xf32, #tpu.memory_space<vmem>>, vector<1x8x128xf32>,
    %c0_15 = arith.constant 0 : index
    %c0_16 = arith.constant 0 : index
    %c0_17 = arith.constant 0 : index
    %35 = vector.load %arg5[%c0_15, %c0_16, %c0_17] : memref<1x8x128xf32, #tpu.memory_space<vmem>>, vector<1x8x128xf32>
    %36 = vector.shape_cast %35 : vector<1x8x128xf32> to vector<8x128xf32>
    %37 = vector.shape_cast %23 : vector<16x128xf32> to vector<2x8x128xf32>
    %cst_18 = arith.constant dense<0.000000e+00> : vector<8x128xf32>
    %38 = vector.multi_reduction <add>, %37, %cst_18 [0] : vector<2x8x128xf32> to vector<8x128xf32>
    %39 = arith.addf %36, %38 : vector<8x128xf32>
    %c0_19 = arith.constant 0 : index
    %c0_20 = arith.constant 0 : index
    %c0_21 = arith.constant 0 : index
    %40 = vector.load %arg5[%c0_19, %c0_20, %c0_21] : memref<1x8x128xf32, #tpu.memory_space<vmem>>, vector<1x8x128xf32>
    %41 = vector.shape_cast %40 : vector<1x8x128xf32> to vector<8x128xf32>
    %42 = vector.shape_cast %39 : vector<8x128xf32> to vector<1x8x128xf32>
    tpu.vector_store %arg5[%c0_19, %c0_20, %c0_21], %42 {strides = array<i32>} : memref<1x8x128xf32, #tpu.memory_space<vmem>>, vector<1x8x128xf32>,
    %c0_22 = arith.constant 0 : index
    %c0_23 = arith.constant 0 : index
    %c0_24 = arith.constant 0 : index
    %43 = vector.load %arg6[%c0_22, %c0_23, %c0_24] : memref<1x8x128xf32, #tpu.memory_space<vmem>>, vector<1x8x128xf32>
    %44 = vector.shape_cast %43 : vector<1x8x128xf32> to vector<8x128xf32>
    %45 = vector.shape_cast %25 : vector<16x128xf32> to vector<2x8x128xf32>
    %cst_25 = arith.constant dense<0.000000e+00> : vector<8x128xf32>
    %46 = vector.multi_reduction <add>, %45, %cst_25 [0] : vector<2x8x128xf32> to vector<8x128xf32>
    %47 = arith.addf %44, %46 : vector<8x128xf32>
    %c0_26 = arith.constant 0 : index
    %c0_27 = arith.constant 0 : index
    %c0_28 = arith.constant 0 : index
    %48 = vector.load %arg6[%c0_26, %c0_27, %c0_28] : memref<1x8x128xf32, #tpu.memory_space<vmem>>, vector<1x8x128xf32>
    %49 = vector.shape_cast %48 : vector<1x8x128xf32> to vector<8x128xf32>
    %50 = vector.shape_cast %47 : vector<8x128xf32> to vector<1x8x128xf32>
    tpu.vector_store %arg6[%c0_26, %c0_27, %c0_28], %50 {strides = array<i32>} : memref<1x8x128xf32, #tpu.memory_space<vmem>>, vector<1x8x128xf32>,
    return
  }
  func.func @transform_0(%arg0: i32, %arg1: i32) -> (i32, i32) {
    %c1_i32 = arith.constant 1 : i32
    %0 = arith.muli %arg0, %c1_i32 : i32
    %1 = arith.addi %0, %arg1 : i32
    %c0_i32 = arith.constant 0 : i32
    %2 = arith.minsi %1, %c0_i32 : i32
    %c0_i32_0 = arith.constant 0 : i32
    %c0_i32_1 = arith.constant 0 : i32
    return %2, %c0_i32_0 : i32, i32
  }
  func.func @transform_1(%arg0: i32, %arg1: i32) -> (i32, i32) {
    %c1_i32 = arith.constant 1 : i32
    %0 = arith.muli %arg0, %c1_i32 : i32
    %1 = arith.addi %0, %arg1 : i32
    %c0_i32 = arith.constant 0 : i32
    %2 = arith.minsi %1, %c0_i32 : i32
    %c0_i32_0 = arith.constant 0 : i32
    %c0_i32_1 = arith.constant 0 : i32
    return %2, %c0_i32_0 : i32, i32
  }
  func.func @transform_2(%arg0: i32, %arg1: i32) -> (i32, i32, i32) {
    %c0_i32 = arith.constant 0 : i32
    %c0_i32_0 = arith.constant 0 : i32
    %c0_i32_1 = arith.constant 0 : i32
    return %arg0, %c0_i32, %c0_i32_0 : i32, i32, i32
  }
  func.func @transform_3(%arg0: i32, %arg1: i32) -> (i32, i32, i32) {
    %c0_i32 = arith.constant 0 : i32
    %c0_i32_0 = arith.constant 0 : i32
    %c0_i32_1 = arith.constant 0 : i32
    return %arg0, %c0_i32, %c0_i32_0 : i32, i32, i32
  }
  func.func @transform_4(%arg0: i32, %arg1: i32) -> (i32, i32, i32) {
    %c0_i32 = arith.constant 0 : i32
    %c0_i32_0 = arith.constant 0 : i32
    %c0_i32_1 = arith.constant 0 : i32
    return %arg0, %c0_i32, %c0_i32_0 : i32, i32, i32
  }
}

</mosaic_0001>

<bundles_post_ra>
// kernel: tpu_custom_call.1
= control target key start
LH: loop header
LB: loop body
LE: loop exit
PB: predicated region body
PF: predicated region fallthrough
CT: control target
= control target key end

     0   :  { %10 = vsyncpa [#allocation3], 0  ;;  %s1269_s0 = inlined_call_operand.hbm [shape: f32[16,128], index: 0, kind: input, shape index: {}]   ;;  %s1270_s1 = inlined_call_operand.hbm [shape: f32[16,128], index: 1, kind: input, shape index: {}]   ;;  %s1271_s2 = inlined_call_operand.hbm [shape: f32[2,8,128], index: 2, kind: output, shape index: {0}]   ;;  %s1272_s3 = inlined_call_operand.hbm [shape: f32[2,8,128], index: 3, kind: output, shape index: {1}]   ;;  %s1273_s4 = inlined_call_operand.hbm [shape: f32[2,8,128], index: 4, kind: output, shape index: {2}]  }
   0x1   :  { %12 = vsyncpa [#allocation3 + $0x1], 0 }
   0x2   :  { %13 = vsyncpa [#allocation6], 0 }
   0x3   :  { %15 = vsyncpa [#allocation6 + $0x1], 0 }
   0x4   :  { %16 = vsyncpa [#allocation4], 0 }
   0x5   :  { %18 = vsyncpa [#allocation4 + $0x1], 0 }
   0x6   :  { %19 = vsyncpa [#allocation9], 0 }
   0x7   :  { %21 = vsyncpa [#allocation9 + $0x1], 0  ;;  %s974_s15 = smov 0   ;;  %s976_s16 = smov 0  }
   0x8   :  { %s978_s17 = smov 0   ;;  %s980_s18 = smov 0  }
   0x9   :  { %s982_s19 = smov 0   ;;  %s984_s20 = smov 0  }
   0xa   :  { %s986_s21 = smov 0   ;;  %s988_s22 = smov 0  }
   0xb LB: > { %s1013_s23 = sadd.s32 4294967295, %s939_s22   ;;  %s1276_s24 = sadd.s32 4294967294, %s939_s22   ;;  %s939_s22 = sphi %s988_s22, %s27_s22   ;;  %s935_s21 = sphi %s986_s21, %s1305_s21   ;;  %s931_s20 = sphi %s984_s20, %s1304_s20   ;;  %s927_s19 = sphi %s982_s19, %s1259_s19   ;;  %s923_s18 = sphi %s980_s18, %s1303_s18   ;;  %s919_s17 = sphi %s978_s17, %s1302_s17   ;;  %s915_s16 = sphi %s976_s16, %s1301_s16   ;;  %s911_s15 = sphi %s974_s15, %s1300_s15  }
   0xc   : > { %s39_s25 = sadd.s32 1, %s935_s21  ;;  %p908_p1 = scmp.ne.s32.totalorder %s927_s19, 0 }
   0xd   : > { %p41_p0 = scmp.ge.s32.totalorder %s39_s25, 2  ;;  %p60_p2 = scmp.eq.s32.totalorder %s939_s22, 0 }
   0xe   : > { %p65_p3 = scmp.ne.s32.totalorder %s927_s19, %s923_s18  ;;  %p66_p5 = scmp.eq.s32.totalorder %s1013_s23, 0 }
   0xf   : > { %s1307_s25 = smov (%p41_p0, %s39_s25), 0  ;;  %p1022_p4 = por %p908_p1, %p60_p2 }
  0x10   : > { %1280 = sst [smem:[#allocation15_spill]] %s1307_s25  ;;  %p1027_p6 = por %p66_p5, %p65_p3 }
  0x11   : > { %s107_s28 = ssub.s32 %s935_s21, %s1307_s25  ;;  %s110_s29 = sadd.s32 1, %s919_s17 }
  0x12   : > { %s1282_s27 = scalar_select %p1027_p6, 1, 0 }
  0x13   : > { %p108_p7 = scmp.eq.s32.totalorder %s107_s28, 0  ;;  %p120_p8 = scmp.ne.s32.totalorder %s919_s17, %s915_s16 }
  0x14   : > { %p121_p9 = scmp.eq.s32.totalorder %s1013_s23, 1  ;;  %p126_p10 = scmp.ne.s32.totalorder %s915_s16, %s911_s15 }
  0x15   : > { %s1035_s30 = scalar_select %p108_p7, %s919_s17, %s110_s29  }
  0x16   : > { %p127_p11 = scmp.eq.s32.totalorder %s1276_s24, 1  ;;  %p1044_p12 = por %p121_p9, %p120_p8 }
  0x17   : > { %p637_p1 = scmp.lt.s32.totalorder %s939_s22, 2  ;;  %s941_s7 = smov [#allocation2]  }
  0x18   : > { %s1283_s5 = scalar_select %p1044_p12, 1, 0 }
  0x19   : > { %p1049_p0 = por %p127_p11, %p126_p10  ;;  %s213_s8 = sshll.u32 %s941_s7, 4  ;;  %s214_s8 = int_to_ptr.vmem [resolvable:$true] %s213_s8 }
  0x1a   : > { %p1056_p2 = pnand %p637_p1, %p1022_p4  ;;  %s722_s12 = scalar_lea.hbm %s1269_s0, 256 }
  0x1b   : > { %s1284_s6 = scalar_select %p1049_p0, 1, 0 }
  0x1c   : > { %p723_p3 = scmp.ne.s32.totalorder %s1269_s0, %s722_s12  ;;  %p724_p5 = pneg %p1056_p2 }
  0x1d   : > { %p729_p8 = scmp.lt.s32.totalorder %s722_s12, %s722_s12 }
  0x1e   : > { %p725_p7 = pnand %p724_p5, %p723_p3 }
  0x20   : > { %p726_p4 = pneg %p725_p7 }
  0x22   : > { %p731_p9 = pnand %p729_p8, %p726_p4 }
  0x24   : > { %734 = shalt.err (!%p731_p9)
}
  0x25   : > { %s735_s18 = scalar_lea.vmem %s214_s8, 256  ;;  %s742_s26 = scalar_lea.vmem %s214_s8, 512 }
  0x26   : > { %p736_p10 = scmp.ne.s32.totalorder %s214_s8, %s735_s18  ;;  %p743_p13 = scmp.lt.s32.totalorder %s214_s8, %s214_s8 }
  0x27   : > { %p744_p0 = scmp.lt.s32.totalorder %s742_s26, %s735_s18 }
  0x28   : > { %p738_p11 = pnand %p736_p10, %p724_p5 }
  0x29   : > { %p745_p12 = por %p744_p0, %p743_p13 }
  0x2a   : > { %p739_p1 = pneg %p738_p11 }
  0x2c   : > { %p746_p6 = pnand %p745_p12, %p739_p1 }
  0x2e   : > { %749 = shalt.err (!%p746_p6)
}
  0x2f   : > { %s942_s28 = smov 128   ;;  %s943_s29 = smov 8  }
  0x30   : > { %623 = dma.hbm_to_vmem [thread:$0]  (!%p1056_p2), %s1269_s0, 256, %s214_s8, [#allocation3], %s942_s28, %s942_s28, %s943_s29  }
  0x31   : > { %p591_p3 = scmp.ge.s32.totalorder %s939_s22, 1  ;;  %p245_p7 = scmp.lt.s32.totalorder %s939_s22, 3 }
  0x32   : > { %s944_s12 = smov [#allocation5]   ;;  %s750_s26 = scalar_lea.hbm %s1270_s1, 256 }
  0x33   : > { %p1081_p4 = pnand %p591_p3, %p245_p7  ;;  %s237_s13 = sshll.u32 %s944_s12, 4  ;;  %s238_s13 = int_to_ptr.vmem [resolvable:$true] %s237_s13 }
  0x34   : > { %p751_p6 = scmp.ne.s32.totalorder %s1270_s1, %s750_s26  ;;  %p757_p0 = scmp.lt.s32.totalorder %s750_s26, %s750_s26 }
  0x35   : > { %s1286_s11 = scalar_select %p1081_p4, 1, 0 }
  0x36   : > { %p753_p12 = pnand %p751_p6, %p724_p5 }
  0x38   : > { %p754_p13 = pneg %p753_p12 }
  0x3a   : > { %p759_p8 = pnand %p757_p0, %p754_p13 }
  0x3c   : > { %762 = shalt.err (!%p759_p8)
}
  0x3d   : > { %s763_s8 = scalar_lea.vmem %s238_s13, 256  ;;  %s770_s7 = scalar_lea.vmem %s238_s13, 512 }
  0x3e   : > { %p764_p9 = scmp.ne.s32.totalorder %s238_s13, %s763_s8  ;;  %p771_p1 = scmp.lt.s32.totalorder %s238_s13, %s238_s13 }
  0x3f   : > { %p772_p3 = scmp.lt.s32.totalorder %s770_s7, %s763_s8 }
  0x40   : > { %p766_p10 = pnand %p764_p9, %p724_p5 }
  0x41   : > { %p773_p7 = por %p772_p3, %p771_p1 }
  0x42   : > { %p767_p11 = pneg %p766_p10 }
  0x44   : > { %p774_p4 = pnand %p773_p7, %p767_p11 }
  0x46   : > { %777 = shalt.err (!%p774_p4)
}
  0x47   : > { %626 = dma.hbm_to_vmem [thread:$0]  (!%p1056_p2), %s1270_s1, 256, %s238_s13, [#allocation6], %s942_s28, %s942_s28, %s943_s29  }
  0x48   : > { %p1287_p6 = scmp.ne.s32.totalorder %s1286_s11, 0 }
  0x49   : > { %s251_s10 = sand.u32 (!%p1287_p6), 1, %s927_s19   ;;  %p1288_p5 = scmp.ne.s32.totalorder (!%p1287_p6), %s1282_s27, 0 }
  0x4a   : > { %249 = sbr.rel (%p1287_p6) target bundleno = 186 (0xba), region = 28  ;;  %s592_s12 = sshll.u32 (!%p1287_p6), %s251_s10, 4 }
  0x4b   : > { %s252_s14 = scalar_lea.sflag (!%p1287_p6), [#allocation3], %s251_s10  ;;  %s255_s18 = scalar_lea.vmem (!%p1287_p6), [#allocation2], %s592_s12 }
  0x4f   : > { %893 = dma.done.wait (%p1288_p5), %s252_s14, 256  }
  0x50   : > { %895 = vsyncadd (%p1288_p5), %s252_s14, 4294967040  ;;  %s261_s9 = scalar_lea.sflag [#allocation6], %s251_s10  ;;  %s264_s26 = scalar_lea.vmem [#allocation5], %s592_s12 }
  0x51   : > { %897 = dma.done.wait (%p1288_p5), %s261_s9, 256  }
  0x52   : > { %899 = vsyncadd (%p1288_p5), %s261_s9, 4294967040  ;;  %s597_s28 = sshll.u32 %s931_s20, 4  ;;  %v325_v0 = vlaneseq  ;;  %s1278_s29 = sand.u32 1, %s915_s16   ;;  %v319_v6 = vld [vmem:[%s264_s26] sm:$0xff]  ;;  %v320_v7 = vld [vmem:[%s264_s26 + $0x8] sm:$0xff]  ;;  %v945_v13 = vmov 0.0  }
  0x53   : > { %v328_v1 = vstv %s597_s28  ;;  %v321_v8 = vld [vmem:[%s255_s18] sm:$0xff]  ;;  %v322_v9 = vld [vmem:[%s255_s18 + $0x8] sm:$0xff]  ;;  %vm331_vm1 = vcmp.gt.f32.partialorder %v319_v6, 0.0  ;;  %vm332_vm2 = vcmp.gt.f32.partialorder %v320_v7, 0.0  ;;  %s1121_s27 = sshll.u32 %s1278_s29, 3  ;;  %s374_s13 = sand.u32 1, %s1013_s23  }
  0x54   : > { %v326_v2 = vshrl.u32 %v325_v0, 7  ;;  %s303_s11 = scalar_lea.vmem [#allocation10], %s1121_s27  ;;  %s603_s7 = sshll.u32 %s931_s20, 7 }
  0x55   : > { %s419_s8 = sshll.u32 %s303_s11, 4  ;;  %s296_s24 = scalar_lea.vmem [#allocation8], %s1121_s27  ;;  %s1147_s8 = int_to_ptr.vmem [resolvable:$true] %s419_s8 }
  0x56   : > { %v327_v3 = vadd.s32 8, %v326_v2  ;;  %v329_v4 = vadd.s32 %v328_v1, %v326_v2  ;;  %s406_s25 = sshll.u32 %s296_s24, 4  ;;  %s1279_s10 = scalar_lea.vmem [#allocation7], %s1121_s27  ;;  %s1157_s25 = int_to_ptr.vmem [resolvable:$true] %s406_s25 }
  0x57   : > { %s393_s12 = sshll.u32 %s1279_s10, 4  ;;  %s1155_s18 = scalar_lea.hbm %s1272_s3, %s603_s7  ;;  %s1169_s12 = int_to_ptr.vmem [resolvable:$true] %s393_s12 }
  0x58   : > { %v330_v5 = vadd.s32 %v328_v1, %v327_v3  ;;  %vm333_vm0 = vcmp.lt.s32.totalorder %v329_v4, 16  ;;  %s1162_s26 = scalar_lea.hbm %s1273_s4, %s603_s7  ;;  %s1167_s29 = scalar_lea.hbm %s1271_s2, %s603_s7 }
  0x59   : > { %vm1115_vm4 = vmand %vm331_vm1, %vm333_vm0  ;;  %s1171_s23 = scalar_lea.sflag [#allocation9], %s374_s13  ;;  %s778_s14 = scalar_lea.vmem %s1157_s25, 128 }
  0x5a   : > { %vm334_vm3 = vcmp.lt.s32.totalorder %v330_v5, 16  ;;  %v339_v12 = vsel %vm1115_vm4, %v321_v8, 1.0  ;;  %v598_v14 = vsel %vm1115_vm4, 1.0, %v945_v13  ;;  %v337_v18 = vsel %vm1115_vm4, %v319_v6, 1.0  ;;  %p779_p2 = scmp.ne.s32.totalorder %s1157_s25, %s778_s14  ;;  %p1293_p4 = scmp.ne.s32.totalorder %s1283_s5, 0 }
  0x5b   : > { %vm1123_vm5 = vmand %vm332_vm2, %vm334_vm3  ;;  %714 = vrcp.f32 %v339_v12  ;;  %s946_s9 = smov [#allocation8]  }
  0x5c   : > { %v340_v15 = vsel %vm1123_vm5, %v322_v9, 1.0  ;;  %v599_v16 = vsel %vm1123_vm5, 1.0, %v945_v13  ;;  %v338_v19 = vsel %vm1123_vm5, %v320_v7, 1.0  ;;  %p780_p12 = pnand %p779_p2, %p1293_p4  ;;  %s782_s20 = sshll.u32 %s946_s9, 4  ;;  %s783_s20 = int_to_ptr.vmem [resolvable:$false] %s782_s20 }
  0x5d   : > { %716 = vrcp.f32 %v340_v15  ;;  %v366_v17 = vadd.f32 %v599_v16, %v598_v14  ;;  %s784_s10 = scalar_lea.vmem %s783_s20, 256  ;;  %p785_p0 = scmp.lt.s32.totalorder %s1157_s25, %s783_s20 }
  0x5e   : > { %p781_p13 = pneg %p780_p12  ;;  %p786_p8 = scmp.lt.s32.totalorder %s784_s10, %s778_s14 }
  0x5f   : > { %368 = vst [vmem:[%s303_s11] sm:$0xff] %v366_v17 }
  0x60   : > { %p787_p9 = por %p786_p8, %p785_p0 }
  0x62   : > { %p788_p10 = pnand %p787_p9, %p781_p13 }
  0x68   : > { %v715_v20 = vpop.eup %714 }
  0x69   : > { %v342_v22 = vmul.f32 %v715_v20, %v337_v18 }
  0x6a   : > { %v717_v21 = vpop.eup %716 }
  0x6b   : > { %v344_v23 = vmul.f32 %v717_v21, %v338_v19  ;;  %718 = vlog2.f32 %v342_v22 }
  0x6d   : > { %720 = vlog2.f32 %v344_v23 }
  0x78   : > { %v719_v24 = vpop.eup %718 }
  0x79   : > { %v346_v26 = vmul.f32 0.6931472, %v719_v24 }
  0x7a   : > { %v721_v25 = vpop.eup %720 }
  0x7b   : > { %v348_v27 = vmul.f32 0.6931472, %v721_v25  ;;  %v349_v28 = vsel %vm1115_vm4, %v346_v26, 0.0 }
  0x7c   : > { %v356_v30 = vmul.f32 %v349_v28, %v349_v28 }
  0x7d   : > { %v350_v29 = vsel %vm1123_vm5, %v348_v27, 0.0 }
  0x7e   : > { %v362_v31 = vadd.f32 %v350_v29, %v349_v28  ;;  %v357_v32 = vmul.f32 %v350_v29, %v350_v29 }
  0x80   : > { %v358_v33 = vadd.f32 %v357_v32, %v356_v30  ;;  %364 = vst [vmem:[%s296_s24] sm:$0xff] %v362_v31 }
  0x81   : > { %791 = shalt.err (!%p788_p10)
}
  0x82   : > { %s792_s13 = scalar_lea.hbm %s1155_s18, 128  ;;  %s796_s28 = scalar_lea.hbm %s1272_s3, 256 }
  0x83   : > { %p793_p11 = scmp.ne.s32.totalorder %s1155_s18, %s792_s13  ;;  %p797_p7 = scmp.lt.s32.totalorder %s1155_s18, %s1272_s3 }
  0x84   : > { %p798_p6 = scmp.lt.s32.totalorder %s796_s28, %s792_s13 }
  0x85   : > { %p794_p1 = pnand %p793_p11, %p1293_p4 }
  0x86   : > { %p799_p5 = por %p798_p6, %p797_p7 }
  0x87   : > { %p795_p3 = pneg %p794_p1 }
  0x89   : > { %p800_p2 = pnand %p799_p5, %p795_p3 }
  0x8b   : > { %803 = shalt.err (!%p800_p2)
}
  0x8c   : > { %615 = dma.vmem_to_hbm [thread:$0]  (%p1293_p4), %s1157_s25, 128, %s1155_s18, %s1171_s23  }
  0x8d   : > { %s1294_s10 = scalar_lea.vmem [#allocation7], %s1121_s27  ;;  %s804_s14 = scalar_lea.vmem %s1147_s8, 128 }
  0x8e   : > { %360 = vst [vmem:[%s1294_s10] sm:$0xff] %v358_v33  ;;  %p805_p12 = scmp.ne.s32.totalorder %s1147_s8, %s804_s14  ;;  %s947_s20 = smov [#allocation10]  }
  0x8f   : > { %s808_s13 = sshll.u32 %s947_s20, 4  ;;  %s809_s13 = int_to_ptr.vmem [resolvable:$false] %s808_s13 }
  0x90   : > { %p806_p13 = pnand %p805_p12, %p1293_p4  ;;  %s810_s7 = scalar_lea.vmem %s809_s13, 256 }
  0x91   : > { %p811_p8 = scmp.lt.s32.totalorder %s1147_s8, %s809_s13  ;;  %p812_p9 = scmp.lt.s32.totalorder %s810_s7, %s804_s14 }
  0x92   : > { %p807_p0 = pneg %p806_p13 }
  0x93   : > { %p813_p10 = por %p812_p9, %p811_p8 }
  0x95   : > { %p814_p11 = pnand %p813_p10, %p807_p0 }
  0x97   : > { %817 = shalt.err (!%p814_p11)
}
  0x98   : > { %s818_s27 = scalar_lea.hbm %s1162_s26, 128  ;;  %s822_s24 = scalar_lea.hbm %s1273_s4, 256 }
  0x99   : > { %p819_p1 = scmp.ne.s32.totalorder %s1162_s26, %s818_s27  ;;  %p823_p6 = scmp.lt.s32.totalorder %s1162_s26, %s1273_s4 }
  0x9a   : > { %p824_p5 = scmp.lt.s32.totalorder %s822_s24, %s818_s27 }
  0x9b   : > { %p820_p3 = pnand %p819_p1, %p1293_p4 }
  0x9c   : > { %p825_p2 = por %p824_p5, %p823_p6 }
  0x9d   : > { %p821_p7 = pneg %p820_p3 }
  0x9f   : > { %p826_p12 = pnand %p825_p2, %p821_p7 }
  0xa1   : > { %829 = shalt.err (!%p826_p12)
}
  0xa2   : > { %616 = dma.vmem_to_hbm [thread:$0]  (%p1293_p4), %s1147_s8, 128, %s1162_s26, %s1171_s23  }
  0xa3   : > { %s1295_s9 = sand.u32 1, %s915_s16   ;;  %s830_s14 = scalar_lea.vmem %s1169_s12, 128 }
  0xa4   : > { %s370_s10 = scalar_lea.sflag [#allocation4], %s1295_s9  ;;  %p831_p13 = scmp.ne.s32.totalorder %s1169_s12, %s830_s14 }
  0xa5   : > { %s948_s20 = smov [#allocation7]  }
  0xa6   : > { %p832_p0 = pnand %p831_p13, %p1293_p4  ;;  %s834_s13 = sshll.u32 %s948_s20, 4  ;;  %s835_s13 = int_to_ptr.vmem [resolvable:$false] %s834_s13 }
  0xa7   : > { %s836_s7 = scalar_lea.vmem %s835_s13, 256  ;;  %p837_p9 = scmp.lt.s32.totalorder %s1169_s12, %s835_s13 }
  0xa8   : > { %p833_p8 = pneg %p832_p0  ;;  %p838_p10 = scmp.lt.s32.totalorder %s836_s7, %s830_s14 }
  0xaa   : > { %p839_p11 = por %p838_p10, %p837_p9 }
  0xac   : > { %p840_p1 = pnand %p839_p11, %p833_p8 }
  0xae   : > { %843 = shalt.err (!%p840_p1)
}
  0xaf   : > { %s844_s8 = scalar_lea.hbm %s1167_s29, 128  ;;  %s848_s27 = scalar_lea.hbm %s1271_s2, 256 }
  0xb0   : > { %p845_p3 = scmp.ne.s32.totalorder %s1167_s29, %s844_s8  ;;  %p849_p5 = scmp.lt.s32.totalorder %s1167_s29, %s1271_s2 }
  0xb1   : > { %p850_p2 = scmp.lt.s32.totalorder %s848_s27, %s844_s8 }
  0xb2   : > { %p846_p7 = pnand %p845_p3, %p1293_p4 }
  0xb3   : > { %p851_p12 = por %p850_p2, %p849_p5 }
  0xb4   : > { %p847_p6 = pneg %p846_p7 }
  0xb6   : > { %p852_p13 = pnand %p851_p12, %p847_p6 }
  0xb8   : > { %855 = shalt.err (!%p852_p13)
}
  0xb9   : > { %614 = dma.vmem_to_hbm [thread:$0]  (%p1293_p4), %s1169_s12, 128, %s1167_s29, %s370_s10  }
  0xba PF: > { %s431_s24 = sand.u32 1, %s911_s15   ;;  %p1296_p0 = scmp.ne.s32.totalorder %s1284_s6, 0 }
  0xbb   : > { %p1297_p8 = scmp.ge.s32.totalorder %s939_s22, 2  ;;  %s432_s28 = scalar_lea.sflag [#allocation4], %s431_s24 }
  0xbd   : > { %p628_p9 = pnand %p1297_p8, %p1296_p0 }
  0xbf   : > { %p629_p10 = pneg %p628_p9 }
  0xc1   : > { %901 = dma.done.wait (%p629_p10), %s432_s28, 128  }
  0xc2   : > { %903 = vsyncadd (%p629_p10), %s432_s28, 4294967168  ;;  %s1298_s11 = sadd.s32 4294967294, %s939_s22  }
  0xc3   : > { %s440_s9 = sand.u32 1, %s1298_s11  }
  0xc4   : > { %s441_s14 = scalar_lea.sflag [#allocation9], %s440_s9 }
  0xc5   : > { %905 = dma.done.wait (%p629_p10), %s441_s14, 256  }
  0xc6   : > { %907 = vsyncadd (%p629_p10), %s441_s14, 4294967040  ;;  %s27_s22 = sadd.s32 1, %s939_s22   ;;  %s1299_s5 = sld [smem:[#allocation15_spill]] }
  0xc7   : > { %p24_p4 = scmp.ge.s32.totalorder %s27_s22, 4   ;;  %s1300_s15 = smov %s915_s16 }
  0xc8   : > { %s1301_s16 = smov %s919_s17  ;;  %s1302_s17 = smov %s1035_s30 }
  0xc9   : > { %s1303_s18 = smov %s927_s19  ;;  %s1259_s19 = smov 0  }
  0xca   : > { %s1304_s20 = smov %s935_s21  ;;  %26 = sbr.rel (!%p24_p4) target bundleno = 11 (0xb), region = 122 }
  0xcc   : > { %s1305_s21 = smov %s1299_s5 }
  0xcf   :  { %455 = vsyncpa [#allocation3], 1 }
  0xd0   :  { %457 = vsyncpa [#allocation3 + $0x1], 1 }
  0xd1   :  { %458 = vsyncpa [#allocation6], 1 }
  0xd2   :  { %460 = vsyncpa [#allocation6 + $0x1], 1 }
  0xd3   :  { %461 = vsyncpa [#allocation4], 1 }
  0xd4   :  { %463 = vsyncpa [#allocation4 + $0x1], 1 }
  0xd5   :  { %464 = vsyncpa [#allocation9], 1 }
  0xd6   :  { %466 = vsyncpa [#allocation9 + $0x1], 1 }

</bundles_post_ra>
